<compile_context>
chip_gen: v5e
topology: v5e:2x2
jax: 0.10.0
libtpu: 0.0.40
codegen_flags: <defaults>
</compile_context>

<pallas_src>
import functools

import jax
import jax.numpy as jnp
from jax import lax
from jax.experimental import pallas as pl
from jax.experimental.pallas import tpu as pltpu


def _netvlad_kernel(x_ref, w_ref, b_ref, acc_out_ref, asum_out_ref,
                    acc_ref, asum_ref):
    """One (batch, N-split, N-tile) triple per grid step.

    x_ref       : (1, D, tN)   local descriptors, native layout (f32 or bf16)
    w_ref       : (K, D)       1x1-conv weight (= 2*alpha*c), bf16
    b_ref       : (K, 1)       conv bias (= -alpha*||c||^2), f32
    acc_out_ref : (1, 1, D, K) partial sum_n a_kn * x_dn, f32
    asum_out_ref: (1, 1, K, 1) partial sum_n a_kn, f32
    acc_ref     : (D, K) f32   VMEM scratch accumulator
    asum_ref    : (K, 1) f32   VMEM scratch accumulator
    """
    t = pl.program_id(2)

    @pl.when(t == 0)
    def _init():
        acc_ref[...] = jnp.zeros_like(acc_ref)
        asum_ref[...] = jnp.zeros_like(asum_ref)

    # Single HBM pass for x: stream the f32 tile and cast to bf16 in-register.
    x = x_ref[0].astype(jnp.bfloat16)                                 # (D, tN)

    # --- 1x1 conv == matmul over D (MXU, bf16 in / f32 out) -------------------
    # w contracts on its lane dim (LHS), x on its sublane dim (RHS): no transpose
    # of the large x operand is needed here.
    s = jnp.dot(w_ref[...], x, preferred_element_type=jnp.float32)    # (K, tN)
    s = s + b_ref[...]                                                # (K,1) bcast

    # --- softmax over K (sublane axis), f32; N fills the 128-wide lane axis ---
    s = s - jnp.max(s, axis=0, keepdims=True)
    e = jnp.exp(s)
    denom = jnp.sum(e, axis=0, keepdims=True)                         # (1, tN)
    a = e * pl.reciprocal(denom, approx=True)                         # (K, tN) f32

    # --- accumulate VLAD terms over this N tile --------------------------------
    asum_ref[...] += jnp.sum(a, axis=1, keepdims=True)                # (K, 1)

    # Accumulate in (D, K) layout: x already contracts on its lane dim, so the
    # only XLU transpose is of the small (K, tN) softmax operand (K << D).
    acc_ref[...] += lax.dot_general(                                  # x @ a^T -> (D, K)
        x, a.astype(jnp.bfloat16),
        dimension_numbers=(((1,), (1,)), ((), ())),
        preferred_element_type=jnp.float32)

    @pl.when(t == pl.num_programs(2) - 1)
    def _finalize():
        acc_out_ref[0, 0] = acc_ref[...]
        asum_out_ref[0, 0] = asum_ref[...]


def _vmem_limit_bytes():
    """Generation-aware scoped-VMEM budget (v5e/v6e: 128 MiB phys, v7x: 64 MiB)."""
    try:
        cap = pltpu.get_tpu_info().vmem_capacity_bytes
    except Exception:
        cap = 64 * 1024 * 1024  # conservative v7x floor
    return int(min(cap * 3 // 4, 100 * 1024 * 1024))


def _pick_tile_n(n_per_split, d, k, x_itemsize, vmem_limit_bytes):
    """Largest N tile that fits the VMEM budget (double-buffered x stream)."""
    fixed = 2 * (k * d * 2 + k * 4)            # w (bf16) + bias (f32) blocks, dbl-buffered
    fixed += 2 * (d * k * 4 + k * 4)           # acc/asum output blocks, dbl-buffered
    fixed += d * k * 4 + k * 4                 # f32 scratch accumulators
    headroom = 4 * 1024 * 1024                 # Mosaic internal scratch / spills
    budget = vmem_limit_bytes - fixed - headroom
    per_col = 2 * d * x_itemsize + 4 * k * 4   # dbl-buffered x column + s/e/a temps
    max_cols = max(128, budget // per_col)
    if n_per_split <= max_cols:
        return int(n_per_split)                # single tile: no accumulation loop
    t = int(max_cols // 128) * 128
    while t >= 128:
        if n_per_split % t == 0:
            return int(t)
        t -= 128
    # Pathological N with no 128-multiple divisor: fall back to the full extent
    # (correct; only an issue for enormous, oddly shaped feature maps).
    return int(n_per_split)


@functools.partial(jax.jit, static_argnums=(2, 3, 4, 5))
def _netvlad_pallas(x_bdn, c, alpha, tile_n, n_split, vmem_limit):
    B, D, N = x_bdn.shape
    K = c.shape[0]
    n_tiles = N // (n_split * tile_n)

    # Conv parameters derived from the cluster centers (as in the PyTorch __init__).
    w = (2.0 * alpha * c).astype(jnp.bfloat16)                              # (K, D)
    bias = (-alpha * jnp.sum(c * c, axis=1))[:, None].astype(jnp.float32)   # (K, 1)

    acc, asum = pl.pallas_call(
        _netvlad_kernel,
        out_shape=(
            jax.ShapeDtypeStruct((B, n_split, D, K), jnp.float32),
            jax.ShapeDtypeStruct((B, n_split, K, 1), jnp.float32),
        ),
        grid_spec=pltpu.PrefetchScalarGridSpec(
            num_scalar_prefetch=0,
            grid=(B, n_split, n_tiles),
            in_specs=[
                pl.BlockSpec((1, D, tile_n),
                             lambda b, s, t, nt=n_tiles: (b, 0, s * nt + t)),  # x tile
                pl.BlockSpec((K, D), lambda b, s, t: (0, 0)),                  # conv weight
                pl.BlockSpec((K, 1), lambda b, s, t: (0, 0)),                  # conv bias
            ],
            out_specs=[
                pl.BlockSpec((1, 1, D, K), lambda b, s, t: (b, s, 0, 0)),
                pl.BlockSpec((1, 1, K, 1), lambda b, s, t: (b, s, 0, 0)),
            ],
            scratch_shapes=[
                pltpu.VMEM((D, K), jnp.float32),   # vlad accumulator (D,K layout)
                pltpu.VMEM((K, 1), jnp.float32),   # sum_n(a) accumulator
            ],
        ),
        compiler_params=pltpu.CompilerParams(
            dimension_semantics=("parallel", "parallel", "arbitrary"),
            vmem_limit_bytes=vmem_limit,
        ),
    )(x_bdn, w, bias)

    # Tiny XLA epilogue: combine split partials, one (D,K)->(K,D) transpose,
    # and the f32 cluster-center residual subtraction (c never enters the kernel).
    acc = jnp.sum(acc, axis=1)                 # (B, D, K)
    asum = jnp.sum(asum, axis=1)               # (B, K, 1)
    return jnp.swapaxes(acc, 1, 2) - c[None, :, :].astype(jnp.float32) * asum


def netvlad_forward(x_nchw, c, alpha=0.1, tile_n=None, n_split=None):
    """x_nchw: (B, D, H, W) f32 (or bf16); c: (K, D) f32.  Returns (B, K, D) f32."""
    B, D, H, W = x_nchw.shape
    K = c.shape[0]
    N = H * W
    assert D % 8 == 0, "feature dim D must be a multiple of 8 (sublane tiling)"

    vmem_limit = _vmem_limit_bytes()

    if n_split is None:
        # For tiny batches, split the spatial axis into parallel partials so both
        # v7x TensorCores get work; partials are summed in the cheap epilogue.
        n_split = 2 if (B == 1 and N % 256 == 0) else 1
    assert N % n_split == 0
    n_per_split = N // n_split
    assert n_split == 1 or n_per_split % 128 == 0

    if tile_n is None:
        tile_n = _pick_tile_n(n_per_split, D, K,
                              jnp.dtype(x_nchw.dtype).itemsize, vmem_limit)
    assert n_per_split % tile_n == 0
    assert tile_n == N or tile_n % 128 == 0, (
        "tile_n must be a multiple of 128 (lane tiling) unless it spans all of N")

    # NCHW -> (B, D, N) is a free reshape; dtype untouched (bf16 cast is in-kernel,
    # so x is read from HBM exactly once).
    x_bdn = x_nchw.reshape(B, D, N)
    return _netvlad_pallas(x_bdn, c, float(alpha), int(tile_n), int(n_split),
                           int(vmem_limit))


def netvlad_reference(x_nchw, c, alpha=0.1):
    """Pure-JAX f32 reference mirroring the PyTorch forward."""
    B, D, H, W = x_nchw.shape
    w = 2.0 * alpha * c                                              # (K, D)
    bias = -alpha * jnp.sum(c * c, axis=1)                           # (K,)
    s = jnp.einsum('bdhw,kd->bkhw', x_nchw, w) + bias[None, :, None, None]
    a = jax.nn.softmax(s, axis=1).reshape(B, c.shape[0], H * W)      # (B, K, N)
    x = x_nchw.reshape(B, D, H * W)                                  # (B, D, N)
    return jnp.einsum('bkn,bdn->bkd', a, x) - c[None] * jnp.sum(a, axis=2)[..., None]


if __name__ == "__main__":
    # TODO(synk): k-means cluster initialization (faiss, in init_clusters) has no
    # Pallas equivalent; cluster centers are drawn randomly here.
    B, D, H, W, K = 2, 128, 16, 16, 32
    alpha = 0.1

    key = jax.random.PRNGKey(0)
    kx, kc = jax.random.split(key)
    x = jax.random.normal(kx, (B, D, H, W), dtype=jnp.float32)
    c = jax.random.normal(kc, (K, D), dtype=jnp.float32)

    ref = netvlad_reference(x, c, alpha)

    def rel_err(out, want):
        return float(jnp.max(jnp.abs(out - want)) / jnp.max(jnp.abs(want)))

    # bf16 conv weight / bf16 MXU inputs / approx reciprocal -> ~1e-2 relative
    # agreement with the f32 reference; tolerance reflects that.
    TOL = 3e-2

    # 1) Default path: auto tile_n spans all of N -> grid (B, 1, 1), no accumulation loop.
    out = jax.block_until_ready(netvlad_forward(x, c, alpha=alpha))
    assert out.shape == (B, K, D)
    assert rel_err(out, ref) < TOL, f"auto-tile mismatch: {rel_err(out, ref):.3e}"

    # 2) Explicit small tile -> exercises the multi-step accumulator path.
    out_t = jax.block_until_ready(netvlad_forward(x, c, alpha=alpha, tile_n=128))
    assert rel_err(out_t, ref) < TOL, f"tiled mismatch: {rel_err(out_t, ref):.3e}"

    # 3) batch == 1 -> spatial axis split into two parallel partials (v7x dual-TC path).
    ref1 = netvlad_reference(x[:1], c, alpha)
    out1 = jax.block_until_ready(netvlad_forward(x[:1], c, alpha=alpha, n_split=2))
    assert rel_err(out1, ref1) < TOL, f"split mismatch: {rel_err(out1, ref1):.3e}"

    print("KERNEL_OK")
</pallas_src>

<mosaic_0001>
module attributes {stable_mosaic.version = 11 : i64} {
  func.func @_netvlad_kernel(%arg0: i32, %arg1: i32, %arg2: i32, %arg3: memref<1x128x256xf32, #tpu.memory_space<vmem>>, %arg4: memref<32x128xbf16, #tpu.memory_space<vmem>>, %arg5: memref<32x1xf32, #tpu.memory_space<vmem>>, %arg6: memref<1x1x128x32xf32, #tpu.memory_space<vmem>>, %arg7: memref<1x1x32x1xf32, #tpu.memory_space<vmem>>, %arg8: memref<128x32xf32, #tpu.memory_space<vmem>>, %arg9: memref<32x1xf32, #tpu.memory_space<vmem>>) attributes {dimension_semantics = [#tpu.dimension_semantics<parallel>, #tpu.dimension_semantics<parallel>, #tpu.dimension_semantics<arbitrary>], iteration_bounds = array<i64: 2, 1, 1>, scalar_prefetch = 0 : i64, scratch_operands = 2 : i64, tpu.core_type = #tpu.core_type<tc>, window_params = [{transform_indices = @transform_0, window_bounds = array<i64: 1, 128, 256>}, {pipeline_mode = #tpu.pipeline_mode<synchronous>, transform_indices = @transform_1, window_bounds = array<i64: 32, 128>}, {pipeline_mode = #tpu.pipeline_mode<synchronous>, transform_indices = @transform_2, window_bounds = array<i64: 32, 1>}, {transform_indices = @transform_3, window_bounds = array<i64: 1, 1, 128, 32>}, {transform_indices = @transform_4, window_bounds = array<i64: 1, 1, 32, 1>}]} {
    %c0_i32 = arith.constant 0 : i32
    %0 = arith.cmpi eq, %arg2, %c0_i32 : i32
    %1 = arith.extui %0 : i1 to i32
    %c0_i32_0 = arith.constant 0 : i32
    %2 = arith.cmpi ne, %1, %c0_i32_0 : i32
    scf.if %2 {
      %cst_21 = arith.constant 0.000000e+00 : f32
      %34 = vector.broadcast %cst_21 : f32 to vector<128x32xf32>
      %c0_22 = arith.constant 0 : index
      %c0_23 = arith.constant 0 : index
      %35 = vector.load %arg8[%c0_22, %c0_23] : memref<128x32xf32, #tpu.memory_space<vmem>>, vector<128x32xf32>
      tpu.vector_store %arg8[%c0_22, %c0_23], %34 {strides = array<i32>} : memref<128x32xf32, #tpu.memory_space<vmem>>, vector<128x32xf32>,
      %cst_24 = arith.constant 0.000000e+00 : f32
      %36 = vector.broadcast %cst_24 : f32 to vector<32x1xf32>
      %c0_25 = arith.constant 0 : index
      %c0_26 = arith.constant 0 : index
      %37 = vector.load %arg9[%c0_25, %c0_26] : memref<32x1xf32, #tpu.memory_space<vmem>>, vector<32x1xf32>
      tpu.vector_store %arg9[%c0_25, %c0_26], %36 {strides = array<i32>} : memref<32x1xf32, #tpu.memory_space<vmem>>, vector<32x1xf32>,
    } else {
    }
    %c0 = arith.constant 0 : index
    %c0_1 = arith.constant 0 : index
    %c0_2 = arith.constant 0 : index
    %3 = vector.load %arg3[%c0, %c0_1, %c0_2] : memref<1x128x256xf32, #tpu.memory_space<vmem>>, vector<1x128x256xf32>
    %4 = vector.shape_cast %3 : vector<1x128x256xf32> to vector<128x256xf32>
    %5 = arith.truncf %4 : vector<128x256xf32> to vector<128x256xbf16>
    %c0_3 = arith.constant 0 : index
    %c0_4 = arith.constant 0 : index
    %6 = vector.load %arg4[%c0_3, %c0_4] : memref<32x128xbf16, #tpu.memory_space<vmem>>, vector<32x128xbf16>
    %cst = arith.constant dense<0.000000e+00> : vector<32x256xf32>
    %7 = tpu.matmul %6, %5, %cst {dimension_numbers = #tpu.dot_dimension_numbers<[1], [0], [0], [1], [0, 0, 1, 1], [], []>} : vector<32x128xbf16>, vector<128x256xbf16>, vector<32x256xf32> -> vector<32x256xf32>
    %c0_5 = arith.constant 0 : index
    %c0_6 = arith.constant 0 : index
    %8 = vector.load %arg5[%c0_5, %c0_6] : memref<32x1xf32, #tpu.memory_space<vmem>>, vector<32x1xf32>
    %9 = vector.broadcast %8 : vector<32x1xf32> to vector<32x256xf32>
    %10 = arith.addf %7, %9 : vector<32x256xf32>
    %cst_7 = arith.constant dense<0xFF800000> : vector<256xf32>
    %11 = vector.multi_reduction <maximumf>, %10, %cst_7 [0] : vector<32x256xf32> to vector<256xf32>
    %12 = vector.shape_cast %11 : vector<256xf32> to vector<1x256xf32>
    %13 = vector.broadcast %12 : vector<1x256xf32> to vector<32x256xf32>
    %14 = arith.subf %10, %13 : vector<32x256xf32>
    %15 = math.exp %14 : vector<32x256xf32>
    %cst_8 = arith.constant dense<0.000000e+00> : vector<256xf32>
    %16 = vector.multi_reduction <add>, %15, %cst_8 [0] : vector<32x256xf32> to vector<256xf32>
    %17 = vector.shape_cast %16 : vector<256xf32> to vector<1x256xf32>
    %18 = tpu.reciprocal %17 {approx = true} : vector<1x256xf32> -> vector<1x256xf32>
    %19 = vector.broadcast %18 : vector<1x256xf32> to vector<32x256xf32>
    %20 = arith.mulf %15, %19 : vector<32x256xf32>
    %c0_9 = arith.constant 0 : index
    %c0_10 = arith.constant 0 : index
    %21 = vector.load %arg9[%c0_9, %c0_10] : memref<32x1xf32, #tpu.memory_space<vmem>>, vector<32x1xf32>
    %cst_11 = arith.constant dense<0.000000e+00> : vector<32xf32>
    %22 = vector.multi_reduction <add>, %20, %cst_11 [1] : vector<32x256xf32> to vector<32xf32>
    %23 = vector.shape_cast %22 : vector<32xf32> to vector<32x1xf32>
    %24 = arith.addf %21, %23 : vector<32x1xf32>
    %c0_12 = arith.constant 0 : index
    %c0_13 = arith.constant 0 : index
    %25 = vector.load %arg9[%c0_12, %c0_13] : memref<32x1xf32, #tpu.memory_space<vmem>>, vector<32x1xf32>
    tpu.vector_store %arg9[%c0_12, %c0_13], %24 {strides = array<i32>} : memref<32x1xf32, #tpu.memory_space<vmem>>, vector<32x1xf32>,
    %c0_14 = arith.constant 0 : index
    %c0_15 = arith.constant 0 : index
    %26 = vector.load %arg8[%c0_14, %c0_15] : memref<128x32xf32, #tpu.memory_space<vmem>>, vector<128x32xf32>
    %27 = arith.truncf %20 : vector<32x256xf32> to vector<32x256xbf16>
    %cst_16 = arith.constant dense<0.000000e+00> : vector<128x32xf32>
    %28 = tpu.matmul %5, %27, %cst_16 {dimension_numbers = #tpu.dot_dimension_numbers<[1], [1], [0], [0], [0, 0, 1, 0], [], []>} : vector<128x256xbf16>, vector<32x256xbf16>, vector<128x32xf32> -> vector<128x32xf32>
    %29 = arith.addf %26, %28 : vector<128x32xf32>
    %c0_17 = arith.constant 0 : index
    %c0_18 = arith.constant 0 : index
    %30 = vector.load %arg8[%c0_17, %c0_18] : memref<128x32xf32, #tpu.memory_space<vmem>>, vector<128x32xf32>
    tpu.vector_store %arg8[%c0_17, %c0_18], %29 {strides = array<i32>} : memref<128x32xf32, #tpu.memory_space<vmem>>, vector<128x32xf32>,
    %c0_i32_19 = arith.constant 0 : i32
    %31 = arith.cmpi eq, %arg2, %c0_i32_19 : i32
    %32 = arith.extui %31 : i1 to i32
    %c0_i32_20 = arith.constant 0 : i32
    %33 = arith.cmpi ne, %32, %c0_i32_20 : i32
    scf.if %33 {
      %c0_21 = arith.constant 0 : index
      %c0_22 = arith.constant 0 : index
      %34 = vector.load %arg8[%c0_21, %c0_22] : memref<128x32xf32, #tpu.memory_space<vmem>>, vector<128x32xf32>
      %c0_23 = arith.constant 0 : index
      %c0_24 = arith.constant 0 : index
      %c0_25 = arith.constant 0 : index
      %c0_26 = arith.constant 0 : index
      %35 = vector.load %arg6[%c0_23, %c0_24, %c0_25, %c0_26] : memref<1x1x128x32xf32, #tpu.memory_space<vmem>>, vector<1x1x128x32xf32>
      %36 = vector.shape_cast %35 : vector<1x1x128x32xf32> to vector<128x32xf32>
      %37 = vector.shape_cast %34 : vector<128x32xf32> to vector<1x1x128x32xf32>
      tpu.vector_store %arg6[%c0_23, %c0_24, %c0_25, %c0_26], %37 {strides = array<i32>} : memref<1x1x128x32xf32, #tpu.memory_space<vmem>>, vector<1x1x128x32xf32>,
      %c0_27 = arith.constant 0 : index
      %c0_28 = arith.constant 0 : index
      %38 = vector.load %arg9[%c0_27, %c0_28] : memref<32x1xf32, #tpu.memory_space<vmem>>, vector<32x1xf32>
      %c0_29 = arith.constant 0 : index
      %c0_30 = arith.constant 0 : index
      %c0_31 = arith.constant 0 : index
      %c0_32 = arith.constant 0 : index
      %39 = vector.load %arg7[%c0_29, %c0_30, %c0_31, %c0_32] : memref<1x1x32x1xf32, #tpu.memory_space<vmem>>, vector<1x1x32x1xf32>
      %40 = vector.shape_cast %39 : vector<1x1x32x1xf32> to vector<32x1xf32>
      %41 = vector.shape_cast %38 : vector<32x1xf32> to vector<1x1x32x1xf32>
      tpu.vector_store %arg7[%c0_29, %c0_30, %c0_31, %c0_32], %41 {strides = array<i32>} : memref<1x1x32x1xf32, #tpu.memory_space<vmem>>, vector<1x1x32x1xf32>,
    } else {
    }
    return
  }
  func.func @transform_0(%arg0: i32, %arg1: i32, %arg2: i32) -> (i32, i32, i32) {
    %c1_i32 = arith.constant 1 : i32
    %0 = arith.muli %arg1, %c1_i32 : i32
    %1 = arith.addi %0, %arg2 : i32
    %c0_i32 = arith.constant 0 : i32
    %c0_i32_0 = arith.constant 0 : i32
    return %arg0, %c0_i32, %1 : i32, i32, i32
  }
  func.func @transform_1(%arg0: i32, %arg1: i32, %arg2: i32) -> (i32, i32) {
    %c0_i32 = arith.constant 0 : i32
    %c0_i32_0 = arith.constant 0 : i32
    %c0_i32_1 = arith.constant 0 : i32
    return %c0_i32, %c0_i32_0 : i32, i32
  }
  func.func @transform_2(%arg0: i32, %arg1: i32, %arg2: i32) -> (i32, i32) {
    %c0_i32 = arith.constant 0 : i32
    %c0_i32_0 = arith.constant 0 : i32
    %c0_i32_1 = arith.constant 0 : i32
    return %c0_i32, %c0_i32_0 : i32, i32
  }
  func.func @transform_3(%arg0: i32, %arg1: i32, %arg2: i32) -> (i32, i32, i32, i32) {
    %c0_i32 = arith.constant 0 : i32
    %c0_i32_0 = arith.constant 0 : i32
    %c0_i32_1 = arith.constant 0 : i32
    return %arg0, %arg1, %c0_i32, %c0_i32_0 : i32, i32, i32, i32
  }
  func.func @transform_4(%arg0: i32, %arg1: i32, %arg2: i32) -> (i32, i32, i32, i32) {
    %c0_i32 = arith.constant 0 : i32
    %c0_i32_0 = arith.constant 0 : i32
    %c0_i32_1 = arith.constant 0 : i32
    return %arg0, %arg1, %c0_i32, %c0_i32_0 : i32, i32, i32, i32
  }
}

</mosaic_0001>

<bundles_post_ra>
// kernel: _netvlad_pallas.1
= control target key start
LH: loop header
LB: loop body
LE: loop exit
PB: predicated region body
PF: predicated region fallthrough
CT: control target
= control target key end

     0   :  { %10 = vsyncpa [#allocation5], 0  ;;  %s1391_s0 = inlined_call_operand.hbm [shape: f32[2,128,256], index: 0, kind: input, shape index: {}]   ;;  %s1392_s1 = inlined_call_operand.vmem [shape: bf16[32,128], index: 1, kind: input, shape index: {}]   ;;  %s1393_s2 = inlined_call_operand.vmem [shape: f32[32,1], index: 2, kind: input, shape index: {}]   ;;  %s1394_s3 = inlined_call_operand.vmem [shape: f32[2,1,128,32], index: 3, kind: output, shape index: {0}]   ;;  %s1395_s4 = inlined_call_operand.vmem [shape: f32[2,1,32,1], index: 4, kind: output, shape index: {1}]  }
   0x1   :  { %12 = vsyncpa [#allocation5 + $0x1], 0  ;;  %s1102_s15 = smov 0   ;;  %s1104_s16 = smov 0  }
   0x2   :  { %s1106_s17 = smov 0   ;;  %s1108_s18 = smov 0  }
   0x3   :  { %s1110_s19 = smov 0   ;;  %s1112_s20 = smov 0  }
   0x4 LB: > { %s878_s21 = sadd.s32 4294967295, %s1071_s20   ;;  %s37_s22 = sadd.s32 1, %s1067_s19  ;;  %s1071_s20 = sphi %s1112_s20, %s18_s20   ;;  %s1067_s19 = sphi %s1110_s19, %s1402_s19   ;;  %s1063_s18 = sphi %s1108_s18, %s1401_s18   ;;  %s1059_s17 = sphi %s1106_s17, %s1400_s17   ;;  %s1055_s16 = sphi %s1104_s16, %s1399_s16   ;;  %s1051_s15 = sphi %s1102_s15, %s1398_s15  }
   0x5   : > { %p39_p0 = scmp.ge.s32.totalorder %s37_s22, 2  ;;  %s48_s23 = sadd.s32 1, %s1059_s17 }
   0x6   : > { %p55_p1 = scmp.ne.s32.totalorder %s1059_s17, %s1055_s16  ;;  %p56_p2 = scmp.eq.s32.totalorder %s1071_s20, 0 }
   0x7   : > { %s1404_s22 = smov (%p39_p0, %s37_s22), 0  ;;  %p61_p4 = scmp.ne.s32.totalorder %s1055_s16, %s1051_s15 }
   0x8   : > { %p1138_p3 = por %p56_p2, %p55_p1  ;;  %s43_s25 = ssub.s32 %s1067_s19, %s1404_s22 }
   0x9   : > { %p62_p5 = scmp.eq.s32.totalorder %s878_s21, 0  ;;  %p46_p6 = scmp.eq.s32.totalorder %s43_s25, 0 }
   0xa   : > { %p916_p8 = scmp.lt.s32.totalorder %s1071_s20, 2  ;;  %s189_s28 = sand.u32 1, %s1059_s17  }
   0xb   : > { %p1145_p7 = por %p62_p5, %p61_p4  ;;  %s901_s29 = sshll.u32 %s1067_s19, 8 }
   0xc   : > { %s1151_s27 = scalar_select %p46_p6, %s1059_s17, %s48_s23  }
   0xd   : > { %s882_s30 = sshll.u32 %s189_s28, 8  ;;  %s201_s7 = scalar_lea.hbm %s1391_s0, %s901_s29 }
   0xe   : > { %s202_s8 = sshll.u32 %s201_s7, 4  ;;  %s193_s9 = scalar_lea.vmem [#allocation4], %s882_s30  ;;  %s203_s8 = int_to_ptr.hbm [resolvable:$true] %s202_s8 }
   0xf   : > { %s204_s10 = sshll.u32 %s193_s9, 4  ;;  %p913_p9 = pnand %p916_p8, %p1138_p3  ;;  %s205_s10 = int_to_ptr.vmem [resolvable:$true] %s204_s10 }
  0x10   : > { %p885_p10 = scmp.ge.s32.totalorder %s1071_s20, 1  ;;  %p212_p11 = scmp.lt.s32.totalorder %s1071_s20, 3 }
  0x11   : > { %s190_s11 = scalar_lea.sflag [#allocation5], %s189_s28  ;;  %s1073_s12 = smov 256  }
  0x12   : > { %s1074_s13 = smov 16   ;;  %p213_p12 = pnand %p885_p10, %p212_p11 }
  0x13   : > { %915 = dma.hbm_to_vmem [thread:$0]  (!%p913_p9), %s203_s8, 4096, %s205_s10, %s190_s11, %s1073_s12, %s1073_s12, %s1074_s13  }
  0x14   : > { %216 = sbr.rel (%p213_p12) target bundleno = 522 (0x20a), region = 32  ;;  %s218_s14 = sand.u32 (!%p213_p12), 1, %s1055_s16  }
  0x15   : > { %s886_s15 = sshll.u32 (!%p213_p12), %s218_s14, 8  ;;  %s219_s21 = scalar_lea.sflag (!%p213_p12), [#allocation5], %s218_s14 }
  0x16   : > { %s1163_s23 = scalar_lea.vmem (!%p213_p12), [#allocation4], %s886_s15 }
  0x19   : > { %1046 = dma.done.wait (%p1145_p7), %s219_s21, 4096  }
  0x1a   : > { %1048 = vsyncadd (%p1145_p7), %s219_s21, 4294963200  ;;  %v336_v0 = vld [vmem:[%s1163_s23 + $0xe0] sm:$0xff]  ;;  %v338_v1 = vld [vmem:[%s1163_s23 + $0xf0] sm:$0xff]  ;;  %v1075_v14 = vmov 0   ;;  %vm303_vm0 = vcmask 7168   ;;  %vm286_vm1 = vcmask 261120  }
  0x1b   : > { %v337_v2 = vld [vmem:[%s1163_s23 + $0xe8] sm:$0xff]  ;;  %v1172_v3 = vpack.c.bf16 %v338_v1, %v336_v0  ;;  %v339_v4 = vld [vmem:[%s1163_s23 + $0xf8] sm:$0xff]  ;;  %v332_v5 = vld [vmem:[%s1163_s23 + $0xc0] sm:$0xff]  ;;  %969 = vset.pattern.permute.xlu0 %v1075_v14  ;;  %970 = vset.pattern.permute.xlu1 %v1075_v14  ;;  %p263_p13 = scmp.lt.s32.totalorder %s1063_s18, 1 }
  0x1c   : > { %v334_v6 = vld [vmem:[%s1163_s23 + $0xd0] sm:$0xff]  ;;  %v1177_v7 = vpack.c.bf16 %v339_v4, %v337_v2  ;;  %v333_v8 = vld [vmem:[%s1163_s23 + $0xc8] sm:$0xff]  ;;  %v335_v9 = vld [vmem:[%s1163_s23 + $0xd8] sm:$0xff] }
  0x1d   : > { %396 = vmatpush.bf16.msra.mxu0 %v1172_v3  ;;  %v1182_v10 = vpack.c.bf16 %v334_v6, %v332_v5  ;;  %v1185_v11 = vpack.c.bf16 %v335_v9, %v333_v8  ;;  %v328_v12 = vld [vmem:[%s1163_s23 + $0xa0] sm:$0xff]  ;;  %v330_v13 = vld [vmem:[%s1163_s23 + $0xb0] sm:$0xff]  ;;  %v329_v15 = vld [vmem:[%s1163_s23 + $0xa8] sm:$0xff]  ;;  %s1406_s18 = smov (!%p263_p13, %s1063_s18), 1 }
  0x1e   : > { %415 = vmatpush.bf16.msra.mxu1 %v1177_v7  ;;  %v331_v16 = vld [vmem:[%s1163_s23 + $0xb8] sm:$0xff]  ;;  %v1192_v17 = vpack.c.bf16 %v330_v13, %v328_v12  ;;  %v324_v19 = vld [vmem:[%s1163_s23 + $0x80] sm:$0xff]  ;;  %v326_v20 = vld [vmem:[%s1163_s23 + $0x90] sm:$0xff]  ;;  %s903_s11 = sshll.u32 %s1406_s18, 5  ;;  %s902_s15 = sshll.u32 %s1406_s18, 7 }
  0x1f   : > { %v1195_v18 = vpack.c.bf16 %v331_v16, %v329_v15  ;;  %v325_v21 = vld [vmem:[%s1163_s23 + $0x88] sm:$0xff]  ;;  %v327_v22 = vld [vmem:[%s1163_s23 + $0x98] sm:$0xff]  ;;  %v1202_v23 = vpack.c.bf16 %v326_v20, %v324_v19  ;;  %v360_v24 = vld [vmem:[%s1393_s2] sm:$0xff]  ;;  %s280_s14 = scalar_lea.vmem %s1395_s4, %s903_s11  ;;  %s1324_s24 = scalar_lea.vmem %s1394_s3, %s902_s15 }
  0x20   : > { %v1208_v25 = vpack.c.bf16 %v327_v22, %v325_v21  ;;  %v320_v26 = vld [vmem:[%s1163_s23 + $0x60] sm:$0xff]  ;;  %v322_v27 = vld [vmem:[%s1163_s23 + $0x70] sm:$0xff]  ;;  %366 = vperm.xlu0 %969, %v360_v24   ;;  %v321_v28 = vld [vmem:[%s1163_s23 + $0x68] sm:$0xff] }
  0x21   : > { %397 = vmatpush.bf16.msra.mxu0 %v1182_v10  ;;  %v323_v29 = vld [vmem:[%s1163_s23 + $0x78] sm:$0xff]  ;;  %v1215_v30 = vpack.c.bf16 %v322_v27, %v320_v26  ;;  %v316_v32 = vld [vmem:[%s1163_s23 + $0x40] sm:$0xff]  ;;  %v318_v33 = vld [vmem:[%s1163_s23 + $0x50] sm:$0xff] }
  0x22   : > { %416 = vmatpush.bf16.msra.mxu1 %v1185_v11  ;;  %v1218_v31 = vpack.c.bf16 %v323_v29, %v321_v28  ;;  %v317_v34 = vld [vmem:[%s1163_s23 + $0x48] sm:$0xff]  ;;  %v319_v35 = vld [vmem:[%s1163_s23 + $0x58] sm:$0xff]  ;;  %v1225_v36 = vpack.c.bf16 %v318_v33, %v316_v32  ;;  %v362_v37 = vld [vmem:[%s1393_s2 + $0x10] sm:$0xff] }
  0x23   : > { %v361_v38 = vld [vmem:[%s1393_s2 + $0x8] sm:$0xff]  ;;  %v1234_v39 = vpack.c.bf16 %v319_v35, %v317_v34  ;;  %v312_v40 = vld [vmem:[%s1163_s23 + $0x20] sm:$0xff]  ;;  %v314_v41 = vld [vmem:[%s1163_s23 + $0x30] sm:$0xff]  ;;  %376 = vperm.xlu1 %970, %v362_v37  }
  0x24   : > { %v313_v42 = vld [vmem:[%s1163_s23 + $0x28] sm:$0xff]  ;;  %v315_v43 = vld [vmem:[%s1163_s23 + $0x38] sm:$0xff]  ;;  %v1241_v44 = vpack.c.bf16 %v314_v41, %v312_v40  ;;  %v308_v46 = vld [vmem:[%s1163_s23] sm:$0xff] }
  0x25   : > { %398 = vmatpush.bf16.msra.mxu0 %v1192_v17  ;;  %v1244_v45 = vpack.c.bf16 %v315_v43, %v313_v42  ;;  %v310_v47 = vld [vmem:[%s1163_s23 + $0x10] sm:$0xff]  ;;  %v309_v48 = vld [vmem:[%s1163_s23 + $0x8] sm:$0xff]  ;;  %v311_v49 = vld [vmem:[%s1163_s23 + $0x18] sm:$0xff] }
  0x26   : > { %417 = vmatpush.bf16.msra.mxu1 %v1195_v18  ;;  %v363_v50 = vld [vmem:[%s1393_s2 + $0x18] sm:$0xff]  ;;  %v1254_v51 = vpack.c.bf16 %v310_v47, %v308_v46  ;;  %v1257_v52 = vpack.c.bf16 %v311_v49, %v309_v48  ;;  %v904_v53 = vld [vmem:[%s1392_s1] sm:$0xff]  ;;  %v905_v54 = vld [vmem:[%s1392_s1 + $0x8] sm:$0xff] }
  0x28   : > { %371 = vperm.xlu0 %969, %v361_v38  }
  0x29   : > { %399 = vmatpush.bf16.msra.mxu0 %v1202_v23 }
  0x2a   : > { %418 = vmatpush.bf16.msra.mxu1 %v1208_v25 }
  0x2b   : > { %381 = vperm.xlu1 %970, %v363_v50  }
  0x2d   : > { %400 = vmatpush.bf16.msra.mxu0 %v1215_v30 }
  0x2e   : > { %419 = vmatpush.bf16.msra.mxu1 %v1218_v31 }
  0x31   : > { %401 = vmatpush.bf16.msra.mxu0 %v1225_v36 }
  0x32   : > { %420 = vmatpush.bf16.msra.mxu1 %v1234_v39 }
  0x35   : > { %402 = vmatpush.bf16.msra.mxu0 %v1241_v44 }
  0x36   : > { %421 = vmatpush.bf16.msra.mxu1 %v1244_v45 }
  0x39   : > { %403 = vmatpush.bf16.msra.mxu0 %v1254_v51 }
  0x3a   : > { %422 = vmatpush.bf16.msra.mxu1 %v1257_v52 }
  0x3c   : > { %404 = vmatmul.bf16.vlgmr.msra.gmra.mxu0 %v904_v53 }
  0x3d   : > { %423 = vmatmul.bf16.vlgmr.msra.gmra.mxu1 %v904_v53 }
  0x4c   : > { %409 = vmatmul.bf16.gmra.mxu0 %v905_v54 }
  0x4d   : > { %428 = vmatmul.bf16.gmra.mxu1 %v905_v54 }
  0x92   : > { %v367_v59 = vpop.permute.xlu0 %366 }
  0x95   : > { %v377_v60 = vpop.permute.xlu1 %376 }
  0x9a   : > { %v372_v63 = vpop.permute.xlu0 %371 }
  0x9d   : > { %v382_v1 = vpop.permute.xlu1 %381 }
  0xb9   : > { %v405_v55 = vpop.f32.mrf.mxu0 }
  0xba   : > { %v424_v56 = vpop.f32.mrf.mxu1  ;;  %v406_v5 = vadd.f32 %v405_v55, %v367_v59 }
  0xbb   : > { %v425_v12 = vadd.f32 %v424_v56, %v367_v59 }
  0xc1   : > { %v407_v57 = vpop.f32.mrf.mxu0 }
  0xc2   : > { %v426_v58 = vpop.f32.mrf.mxu1  ;;  %v408_v6 = vadd.f32 %v407_v57, %v372_v63 }
  0xc3   : > { %v427_v13 = vadd.f32 %v426_v58, %v372_v63 }
  0xc9   : > { %v410_v61 = vpop.f32.mrf.mxu0 }
  0xca   : > { %v429_v62 = vpop.f32.mrf.mxu1  ;;  %v411_v0 = vadd.f32 %v410_v61, %v377_v60 }
  0xcb   : > { %v430_v2 = vadd.f32 %v429_v62, %v377_v60 }
  0xcc   : > { %v434_v15 = vmax.f32 %v406_v5, %v411_v0 }
  0xcd   : > { %v443_v19 = vmax.f32 %v425_v12, %v430_v2 }
  0xd1   : > { %v412_v4 = vpop.f32.mrf.mxu0 }
  0xd2   : > { %v413_v8 = vadd.f32 %v412_v4, %v382_v1  ;;  %v431_v9 = vpop.f32.mrf.mxu1 }
  0xd3   : > { %v432_v14 = vadd.f32 %v431_v9, %v382_v1 }
  0xd4   : > { %v435_v16 = vmax.f32 %v408_v6, %v413_v8 }
  0xd5   : > { %v444_v20 = vmax.f32 %v427_v13, %v432_v14 }
  0xd6   : > { %v436_v21 = vmax.f32 %v434_v15, %v435_v16 }
  0xd7   : > { %v445_v22 = vmax.f32 %v443_v19, %v444_v20 }
  0xd8   : > { %v437_v24 = vrot.slane %v436_v21, 4 }
  0xd9   : > { %v446_v26 = vrot.slane %v445_v22, 4 }
  0xda   : > { %v438_v27 = vmax.f32 %v436_v21, %v437_v24 }
  0xdb   : > { %v447_v28 = vmax.f32 %v445_v22, %v446_v26 }
  0xdc   : > { %v439_v29 = vrot.slane %v438_v27, 2 }
  0xdd   : > { %v448_v32 = vrot.slane %v447_v28, 2 }
  0xde   : > { %v440_v33 = vmax.f32 %v438_v27, %v439_v29 }
  0xdf   : > { %v449_v34 = vmax.f32 %v447_v28, %v448_v32 }
  0xe0   : > { %v441_v35 = vrot.slane %v440_v33, 1 }
  0xe1   : > { %v450_v37 = vrot.slane %v449_v34, 1 }
  0xe2   : > { %v442_v38 = vmax.f32 %v440_v33, %v441_v35 }
  0xe3   : > { %v451_v40 = vmax.f32 %v449_v34, %v450_v37 }
  0xe4   : > { %v452_v41 = vsub.f32 %v406_v5, %v442_v38  ;;  %v454_v42 = vsub.f32 %v408_v6, %v442_v38  ;;  %v456_v43 = vsub.f32 %v411_v0, %v442_v38  ;;  %v458_v46 = vsub.f32 %v413_v8, %v442_v38 }
  0xe5   : > { %v453_v47 = vsub.f32 %v425_v12, %v451_v40  ;;  %v455_v48 = vsub.f32 %v427_v13, %v451_v40  ;;  %v457_v55 = vsub.f32 %v430_v2, %v451_v40  ;;  %v459_v57 = vsub.f32 %v432_v14, %v451_v40 }
  0xe6   : > { %v460_v49 = vmul.f32 1.442695, %v452_v41  ;;  %v464_v50 = vmul.f32 1.442695, %v454_v42  ;;  %v468_v53 = vmul.f32 1.442695, %v456_v43 }
  0xe7   : > { %v472_v54 = vmul.f32 1.442695, %v458_v46  ;;  %v462_v56 = vmul.f32 1.442695, %v453_v47  ;;  %v466_v58 = vmul.f32 1.442695, %v455_v48 }
  0xe8   : > { %971 = vpow2.f32 %v460_v49  ;;  %v470_v59 = vmul.f32 1.442695, %v457_v55  ;;  %v474_v60 = vmul.f32 1.442695, %v459_v57 }
  0xe9   : > { %973 = vpow2.f32 %v464_v50 }
  0xea   : > { %975 = vpow2.f32 %v468_v53 }
  0xeb   : > { %977 = vpow2.f32 %v472_v54 }
  0xec   : > { %979 = vpow2.f32 %v462_v56 }
  0xed   : > { %981 = vpow2.f32 %v466_v58 }
  0xee   : > { %v972_v61 = vpop.eup %971  ;;  %983 = vpow2.f32 %v470_v59 }
  0xef   : > { %v974_v62 = vpop.eup %973  ;;  %985 = vpow2.f32 %v474_v60 }
  0xf0   : > { %v976_v63 = vpop.eup %975  ;;  %v476_v0 = vadd.f32 %v974_v62, %v972_v61 }
  0xf1   : > { %v978_v1 = vpop.eup %977 }
  0xf2   : > { %v980_v4 = vpop.eup %979  ;;  %v477_v2 = vadd.f32 %v976_v63, %v476_v0 }
  0xf3   : > { %v982_v5 = vpop.eup %981 }
  0xf4   : > { %v478_v6 = vadd.f32 %v978_v1, %v477_v2  ;;  %v485_v8 = vadd.f32 %v982_v5, %v980_v4  ;;  %v984_v9 = vpop.eup %983 }
  0xf5   : > { %v986_v14 = vpop.eup %985 }
  0xf6   : > { %v479_v12 = vrot.slane %v478_v6, 4  ;;  %v486_v13 = vadd.f32 %v984_v9, %v485_v8 }
  0xf8   : > { %v480_v15 = vadd.f32 %v479_v12, %v478_v6  ;;  %v487_v16 = vadd.f32 %v986_v14, %v486_v13 }
  0xfa   : > { %v481_v19 = vrot.slane %v480_v15, 2  ;;  %v488_v20 = vrot.slane %v487_v16, 4 }
  0xfc   : > { %v482_v21 = vadd.f32 %v481_v19, %v480_v15  ;;  %v489_v22 = vadd.f32 %v488_v20, %v487_v16 }
  0xfe   : > { %v483_v24 = vrot.slane %v482_v21, 1  ;;  %v490_v26 = vrot.slane %v489_v22, 2 }
 0x100   : > { %v484_v27 = vadd.f32 %v483_v24, %v482_v21  ;;  %v491_v28 = vadd.f32 %v490_v26, %v489_v22 }
 0x102   : > { %987 = vrcp.f32 %v484_v27  ;;  %v492_v29 = vrot.slane %v491_v28, 1 }
 0x104   : > { %v493_v32 = vadd.f32 %v492_v29, %v491_v28 }
 0x106   : > { %989 = vrcp.f32 %v493_v32 }
 0x108   : > { %v988_v33 = vpop.eup %987 }
 0x109   : > { %v502_v34 = vmul.f32 %v988_v33, %v978_v1  ;;  %v500_v35 = vmul.f32 %v988_v33, %v976_v63  ;;  %v496_v38 = vmul.f32 %v988_v33, %v972_v61  ;;  %v498_v46 = vmul.f32 %v988_v33, %v974_v62 }
 0x10b   : > { %v547_v37 = vpack.c.bf16 %v502_v34, %v500_v35  ;;  %v545_v53 = vpack.c.bf16 %v498_v46, %v496_v38 }
 0x10c   : > { %v990_v40 = vpop.eup %989 }
 0x10d   : > { %v501_v41 = vmul.f32 %v990_v40, %v984_v9  ;;  %v503_v42 = vmul.f32 %v990_v40, %v986_v14  ;;  %555 = vmatpush.bf16.xpose.msrb.mxu0 %v547_v37  ;;  %906 = vmatpush.bf16.xpose.msra.mxu2 %v547_v37  ;;  %v497_v43 = vmul.f32 %v990_v40, %v980_v4 }
 0x10e   : > { %v499_v54 = vmul.f32 %v990_v40, %v982_v5 }
 0x10f   : > { %v548_v47 = vpack.c.bf16 %v503_v42, %v501_v41  ;;  %v517_v48 = vadd.f32 %v503_v42, %v502_v34  ;;  %v514_v49 = vadd.f32 %v501_v41, %v500_v35  ;;  %v508_v50 = vadd.f32 %v497_v43, %v496_v38 }
 0x110   : > { %v546_v55 = vpack.c.bf16 %v499_v54, %v497_v43  ;;  %v511_v56 = vadd.f32 %v499_v54, %v498_v46 }
 0x111   : > { %604 = vmatpush.bf16.xpose.msrb.mxu1 %v548_v47  ;;  %908 = vmatpush.bf16.xpose.msra.mxu3 %v548_v47 }
 0x112   : > { %518 = vadd.xlane.f32.xlu1 %v517_v48  ;;  %515 = vadd.xlane.f32.xlu0 %v514_v49 }
 0x113   : > { %509 = vadd.xlane.f32.xlu2 %v508_v50 }
 0x115   : > { %556 = vmatpush.bf16.xpose.msrb.mxu0 %v545_v53  ;;  %907 = vmatpush.bf16.xpose.msra.mxu2 %v545_v53 }
 0x119   : > { %605 = vmatpush.bf16.xpose.msrb.mxu1 %v546_v55  ;;  %909 = vmatpush.bf16.xpose.msra.mxu3 %v546_v55 }
 0x11b   : > { %512 = vadd.xlane.f32.xlu2 %v511_v56 }
 0x11c   : > { %567 = vmatmul.bf16.vlgmr.msra.gmra.mxu2 %v1225_v36  ;;  %557 = vmatmul.bf16.vlgmr.msrb.gmra.mxu0 %v1254_v51  ;;  %v1076_v36 = vmov 0.0  }
 0x11d   : > { %307 = vst.msk [vmem:[#allocation3 + $0x18] sm:$0xff] %vm303_vm0, %v1076_v36 }
 0x11e   : > { %304 = vst.msk [vmem:[#allocation3] sm:$0xff] %vm303_vm0, %v1076_v36 }
 0x11f   : > { %305 = vst.msk [vmem:[#allocation3 + $0x8] sm:$0xff] %vm303_vm0, %v1076_v36 }
 0x120   : > { %616 = vmatmul.bf16.vlgmr.msra.gmra.mxu3 %v1234_v39  ;;  %606 = vmatmul.bf16.vlgmr.msrb.gmra.mxu1 %v1257_v52  ;;  %306 = vst.msk [vmem:[#allocation3 + $0x10] sm:$0xff] %vm303_vm0, %v1076_v36 }
 0x121   : > { %291 = vst.msk [vmem:[#allocation2 + $0x20] sm:$0xff] %vm286_vm1, %v1076_v36 }
 0x122   : > { %287 = vst.msk [vmem:[#allocation2] sm:$0xff] %vm286_vm1, %v1076_v36 }
 0x123   : > { %288 = vst.msk [vmem:[#allocation2 + $0x8] sm:$0xff] %vm286_vm1, %v1076_v36 }
 0x124   : > { %289 = vst.msk [vmem:[#allocation2 + $0x10] sm:$0xff] %vm286_vm1, %v1076_v36 }
 0x125   : > { %290 = vst.msk [vmem:[#allocation2 + $0x18] sm:$0xff] %vm286_vm1, %v1076_v36 }
 0x126   : > { %292 = vst.msk [vmem:[#allocation2 + $0x28] sm:$0xff] %vm286_vm1, %v1076_v36 }
 0x127   : > { %293 = vst.msk [vmem:[#allocation2 + $0x30] sm:$0xff] %vm286_vm1, %v1076_v36 }
 0x128   : > { %294 = vst.msk [vmem:[#allocation2 + $0x38] sm:$0xff] %vm286_vm1, %v1076_v36  ;;  %v533_v59 = vld [vmem:[#allocation2 + $0x20] sm:$0xff] }
 0x129   : > { %295 = vst.msk [vmem:[#allocation2 + $0x40] sm:$0xff] %vm286_vm1, %v1076_v36  ;;  %v529_v27 = vld [vmem:[#allocation2] sm:$0xff] }
 0x12a   : > { %296 = vst.msk [vmem:[#allocation2 + $0x48] sm:$0xff] %vm286_vm1, %v1076_v36  ;;  %v530_v43 = vld [vmem:[#allocation2 + $0x8] sm:$0xff] }
 0x12b   : > { %297 = vst.msk [vmem:[#allocation2 + $0x50] sm:$0xff] %vm286_vm1, %v1076_v36 }
 0x12c   : > { %572 = vmatmul.bf16.gmra.mxu2 %v1215_v30  ;;  %562 = vmatmul.bf16.gmra.mxu0 %v1241_v44  ;;  %298 = vst.msk [vmem:[#allocation2 + $0x58] sm:$0xff] %vm286_vm1, %v1076_v36 }
 0x12d   : > { %299 = vst.msk [vmem:[#allocation2 + $0x60] sm:$0xff] %vm286_vm1, %v1076_v36  ;;  %v534_v0 = vld [vmem:[#allocation2 + $0x28] sm:$0xff] }
 0x12e   : > { %300 = vst.msk [vmem:[#allocation2 + $0x68] sm:$0xff] %vm286_vm1, %v1076_v36  ;;  %v535_v8 = vld [vmem:[#allocation2 + $0x30] sm:$0xff] }
 0x12f   : > { %301 = vst.msk [vmem:[#allocation2 + $0x70] sm:$0xff] %vm286_vm1, %v1076_v36  ;;  %v536_v16 = vld [vmem:[#allocation2 + $0x38] sm:$0xff] }
 0x130   : > { %621 = vmatmul.bf16.gmra.mxu3 %v1218_v31  ;;  %611 = vmatmul.bf16.gmra.mxu1 %v1244_v45  ;;  %v505_v31 = vld [vmem:[#allocation3 + $0x8] sm:$0xff]  ;;  %302 = vst.msk [vmem:[#allocation2 + $0x78] sm:$0xff] %vm286_vm1, %v1076_v36  ;;  %v537_v32 = vld [vmem:[#allocation2 + $0x40] sm:$0xff] }
 0x131   : > { %v538_v47 = vld [vmem:[#allocation2 + $0x48] sm:$0xff] }
 0x13c   : > { %577 = vmatmul.bf16.gmra.mxu2 %v1202_v23 }
 0x140   : > { %626 = vmatmul.bf16.gmra.mxu3 %v1208_v25 }
 0x14c   : > { %582 = vmatmul.bf16.gmra.mxu2 %v1192_v17  ;;  %v507_v17 = vld [vmem:[#allocation3 + $0x18] sm:$0xff] }
 0x150   : > { %631 = vmatmul.bf16.gmra.mxu3 %v1195_v18  ;;  %v506_v18 = vld [vmem:[#allocation3 + $0x10] sm:$0xff] }
 0x15c   : > { %587 = vmatmul.bf16.gmra.mxu2 %v1182_v10  ;;  %v504_v10 = vld [vmem:[#allocation3] sm:$0xff] }
 0x160   : > { %636 = vmatmul.bf16.gmra.mxu3 %v1185_v11 }
 0x16c   : > { %592 = vmatmul.bf16.gmra.mxu2 %v1172_v3 }
 0x170   : > { %641 = vmatmul.bf16.gmra.mxu3 %v1177_v7 }
 0x185   : > { %v519_v11 = vpop.xlane.xlu1 %518  ;;  %v516_v23 = vpop.xlane.xlu0 %515 }
 0x186   : > { %v523_v3 = vadd.f32 %v519_v11, %v507_v17  ;;  %v522_v7 = vadd.f32 %v516_v23, %v506_v18  ;;  %v510_v25 = vpop.xlane.xlu2 %509  ;;  %v531_v17 = vld [vmem:[#allocation2 + $0x10] sm:$0xff] }
 0x187   : > { %v520_v30 = vadd.f32 %v510_v25, %v504_v10  ;;  %v539_v11 = vld [vmem:[#allocation2 + $0x50] sm:$0xff] }
 0x188   : > { %528 = vst.msk [vmem:[#allocation3 + $0x18] sm:$0xff] %vm303_vm0, %v523_v3 }
 0x189   : > { %527 = vst.msk [vmem:[#allocation3 + $0x10] sm:$0xff] %vm303_vm0, %v522_v7 }
 0x18a   : > { %525 = vst.msk [vmem:[#allocation3] sm:$0xff] %vm303_vm0, %v520_v30 }
 0x18e   : > { %v513_v39 = vpop.xlane.xlu2 %512 }
 0x18f   : > { %v718_v44 = vld [vmem:[#allocation3 + $0x18] sm:$0xff]  ;;  %v521_v45 = vadd.f32 %v513_v39, %v505_v31 }
 0x190   : > { %722 = vst.msk [vmem:[%s280_s14 + $0x18] sm:$0xff] %vm303_vm0, %v718_v44  ;;  %v717_v51 = vld [vmem:[#allocation3 + $0x10] sm:$0xff] }
 0x191   : > { %721 = vst.msk [vmem:[%s280_s14 + $0x10] sm:$0xff] %vm303_vm0, %v717_v51  ;;  %v715_v52 = vld [vmem:[#allocation3] sm:$0xff]  ;;  %v532_v51 = vld [vmem:[#allocation2 + $0x18] sm:$0xff] }
 0x192   : > { %719 = vst.msk [vmem:[%s280_s14] sm:$0xff] %vm303_vm0, %v715_v52 }
 0x193   : > { %526 = vst.msk [vmem:[#allocation3 + $0x8] sm:$0xff] %vm303_vm0, %v521_v45 }
 0x199   : > { %v558_v26 = vpop.f32.mrf.mxu0 }
 0x19a   : > { %v716_v57 = vld [vmem:[#allocation3 + $0x8] sm:$0xff] }
 0x19b   : > { %720 = vst.msk [vmem:[%s280_s14 + $0x8] sm:$0xff] %vm303_vm0, %v716_v57  ;;  %v540_v57 = vld [vmem:[#allocation2 + $0x58] sm:$0xff] }
 0x19d   : > { %v607_v28 = vpop.f32.mrf.mxu1 }
 0x19e   : > { %v608_v29 = vadd.f32 %v607_v28, %v558_v26  ;;  %v544_v28 = vld [vmem:[#allocation2 + $0x78] sm:$0xff] }
 0x19f   : > { %v568_v58 = vpop.f32.mrf.mxu2 }
 0x1a0   : > { %v647_v34 = vadd.f32 %v608_v29, %v529_v27 }
 0x1a1   : > { %v560_v40 = vpop.f32.mrf.mxu0 }
 0x1a2   : > { %664 = vst.msk [vmem:[#allocation2] sm:$0xff] %vm286_vm1, %v647_v34 }
 0x1a3   : > { %v617_v60 = vpop.f32.mrf.mxu3 }
 0x1a4   : > { %v618_v61 = vadd.f32 %v617_v60, %v568_v58 }
 0x1a5   : > { %v609_v42 = vpop.f32.mrf.mxu1 }
 0x1a6   : > { %v651_v62 = vadd.f32 %v618_v61, %v533_v59  ;;  %v610_v46 = vadd.f32 %v609_v42, %v560_v40 }
 0x1a7   : > { %v570_v63 = vpop.f32.mrf.mxu2 }
 0x1a8   : > { %668 = vst.msk [vmem:[#allocation2 + $0x20] sm:$0xff] %vm286_vm1, %v651_v62  ;;  %v648_v49 = vadd.f32 %v610_v46, %v530_v43 }
 0x1a9   : > { %v683_v53 = vld [vmem:[#allocation2] sm:$0xff]  ;;  %v563_v36 = vpop.f32.mrf.mxu0 }
 0x1aa   : > { %699 = vst.msk [vmem:[%s1324_s24] sm:$0xff] %vm286_vm1, %v683_v53 }
 0x1ab   : > { %v619_v1 = vpop.f32.mrf.mxu3  ;;  %665 = vst.msk [vmem:[#allocation2 + $0x8] sm:$0xff] %vm286_vm1, %v648_v49 }
 0x1ac   : > { %v620_v4 = vadd.f32 %v619_v1, %v570_v63  ;;  %v541_v1 = vld [vmem:[#allocation2 + $0x60] sm:$0xff] }
 0x1ad   : > { %v612_v18 = vpop.f32.mrf.mxu1 }
 0x1ae   : > { %v652_v2 = vadd.f32 %v620_v4, %v534_v0  ;;  %v613_v10 = vadd.f32 %v612_v18, %v563_v36 }
 0x1af   : > { %v687_v5 = vld [vmem:[#allocation2 + $0x20] sm:$0xff]  ;;  %v573_v6 = vpop.f32.mrf.mxu2 }
 0x1b0   : > { %703 = vst.msk [vmem:[%s1324_s24 + $0x20] sm:$0xff] %vm286_vm1, %v687_v5  ;;  %v649_v3 = vadd.f32 %v613_v10, %v531_v17 }
 0x1b1   : > { %669 = vst.msk [vmem:[#allocation2 + $0x28] sm:$0xff] %vm286_vm1, %v652_v2  ;;  %v565_v39 = vpop.f32.mrf.mxu0 }
 0x1b2   : > { %v684_v25 = vld [vmem:[#allocation2 + $0x8] sm:$0xff]  ;;  %666 = vst.msk [vmem:[#allocation2 + $0x10] sm:$0xff] %vm286_vm1, %v649_v3 }
 0x1b3   : > { %v622_v9 = vpop.f32.mrf.mxu3  ;;  %700 = vst.msk [vmem:[%s1324_s24 + $0x8] sm:$0xff] %vm286_vm1, %v684_v25 }
 0x1b4   : > { %v623_v12 = vadd.f32 %v622_v9, %v573_v6 }
 0x1b5   : > { %v614_v45 = vpop.f32.mrf.mxu1 }
 0x1b6   : > { %v653_v13 = vadd.f32 %v623_v12, %v535_v8  ;;  %v615_v52 = vadd.f32 %v614_v45, %v565_v39  ;;  %v542_v12 = vld [vmem:[#allocation2 + $0x68] sm:$0xff] }
 0x1b7   : > { %v575_v14 = vpop.f32.mrf.mxu2 }
 0x1b8   : > { %v688_v15 = vld [vmem:[#allocation2 + $0x28] sm:$0xff]  ;;  %670 = vst.msk [vmem:[#allocation2 + $0x30] sm:$0xff] %vm286_vm1, %v653_v13  ;;  %v650_v59 = vadd.f32 %v615_v52, %v532_v51 }
 0x1b9   : > { %704 = vst.msk [vmem:[%s1324_s24 + $0x28] sm:$0xff] %vm286_vm1, %v688_v15  ;;  %v685_v61 = vld [vmem:[#allocation2 + $0x10] sm:$0xff] }
 0x1ba   : > { %701 = vst.msk [vmem:[%s1324_s24 + $0x10] sm:$0xff] %vm286_vm1, %v685_v61 }
 0x1bb   : > { %v624_v19 = vpop.f32.mrf.mxu3  ;;  %667 = vst.msk [vmem:[#allocation2 + $0x18] sm:$0xff] %vm286_vm1, %v650_v59 }
 0x1bc   : > { %v625_v20 = vadd.f32 %v624_v19, %v575_v14 }
 0x1be   : > { %v654_v21 = vadd.f32 %v625_v20, %v536_v16  ;;  %v543_v20 = vld [vmem:[#allocation2 + $0x70] sm:$0xff] }
 0x1bf   : > { %v689_v22 = vld [vmem:[#allocation2 + $0x30] sm:$0xff]  ;;  %v578_v24 = vpop.f32.mrf.mxu2 }
 0x1c0   : > { %705 = vst.msk [vmem:[%s1324_s24 + $0x30] sm:$0xff] %vm286_vm1, %v689_v22 }
 0x1c1   : > { %671 = vst.msk [vmem:[#allocation2 + $0x38] sm:$0xff] %vm286_vm1, %v654_v21 }
 0x1c2   : > { %v686_v5 = vld [vmem:[#allocation2 + $0x18] sm:$0xff] }
 0x1c3   : > { %v627_v33 = vpop.f32.mrf.mxu3  ;;  %702 = vst.msk [vmem:[%s1324_s24 + $0x18] sm:$0xff] %vm286_vm1, %v686_v5 }
 0x1c4   : > { %v628_v35 = vadd.f32 %v627_v33, %v578_v24 }
 0x1c6   : > { %v655_v37 = vadd.f32 %v628_v35, %v537_v32 }
 0x1c7   : > { %v580_v38 = vpop.f32.mrf.mxu2 }
 0x1c8   : > { %v690_v41 = vld [vmem:[#allocation2 + $0x38] sm:$0xff]  ;;  %672 = vst.msk [vmem:[#allocation2 + $0x40] sm:$0xff] %vm286_vm1, %v655_v37 }
 0x1c9   : > { %706 = vst.msk [vmem:[%s1324_s24 + $0x38] sm:$0xff] %vm286_vm1, %v690_v41 }
 0x1cb   : > { %v629_v48 = vpop.f32.mrf.mxu3 }
 0x1cc   : > { %v630_v50 = vadd.f32 %v629_v48, %v580_v38 }
 0x1ce   : > { %v656_v54 = vadd.f32 %v630_v50, %v538_v47 }
 0x1cf   : > { %v691_v55 = vld [vmem:[#allocation2 + $0x40] sm:$0xff]  ;;  %v583_v56 = vpop.f32.mrf.mxu2 }
 0x1d0   : > { %707 = vst.msk [vmem:[%s1324_s24 + $0x40] sm:$0xff] %vm286_vm1, %v691_v55 }
 0x1d1   : > { %673 = vst.msk [vmem:[#allocation2 + $0x48] sm:$0xff] %vm286_vm1, %v656_v54 }
 0x1d3   : > { %v632_v23 = vpop.f32.mrf.mxu3 }
 0x1d4   : > { %v633_v7 = vadd.f32 %v632_v23, %v583_v56 }
 0x1d6   : > { %v657_v30 = vadd.f32 %v633_v7, %v539_v11 }
 0x1d7   : > { %v585_v31 = vpop.f32.mrf.mxu2 }
 0x1d8   : > { %v692_v44 = vld [vmem:[#allocation2 + $0x48] sm:$0xff]  ;;  %674 = vst.msk [vmem:[#allocation2 + $0x50] sm:$0xff] %vm286_vm1, %v657_v30 }
 0x1d9   : > { %708 = vst.msk [vmem:[%s1324_s24 + $0x48] sm:$0xff] %vm286_vm1, %v692_v44 }
 0x1db   : > { %v634_v58 = vpop.f32.mrf.mxu3 }
 0x1dc   : > { %v635_v60 = vadd.f32 %v634_v58, %v585_v31 }
 0x1de   : > { %v658_v62 = vadd.f32 %v635_v60, %v540_v57 }
 0x1df   : > { %v693_v63 = vld [vmem:[#allocation2 + $0x50] sm:$0xff]  ;;  %v588_v0 = vpop.f32.mrf.mxu2 }
 0x1e0   : > { %709 = vst.msk [vmem:[%s1324_s24 + $0x50] sm:$0xff] %vm286_vm1, %v693_v63 }
 0x1e1   : > { %675 = vst.msk [vmem:[#allocation2 + $0x58] sm:$0xff] %vm286_vm1, %v658_v62 }
 0x1e3   : > { %v637_v4 = vpop.f32.mrf.mxu3 }
 0x1e4   : > { %v638_v2 = vadd.f32 %v637_v4, %v588_v0 }
 0x1e6   : > { %v659_v6 = vadd.f32 %v638_v2, %v541_v1 }
 0x1e7   : > { %v590_v8 = vpop.f32.mrf.mxu2 }
 0x1e8   : > { %v694_v9 = vld [vmem:[#allocation2 + $0x58] sm:$0xff]  ;;  %676 = vst.msk [vmem:[#allocation2 + $0x60] sm:$0xff] %vm286_vm1, %v659_v6 }
 0x1e9   : > { %710 = vst.msk [vmem:[%s1324_s24 + $0x58] sm:$0xff] %vm286_vm1, %v694_v9 }
 0x1eb   : > { %v639_v13 = vpop.f32.mrf.mxu3 }
 0x1ec   : > { %v640_v14 = vadd.f32 %v639_v13, %v590_v8 }
 0x1ee   : > { %v660_v15 = vadd.f32 %v640_v14, %v542_v12 }
 0x1ef   : > { %v695_v16 = vld [vmem:[#allocation2 + $0x60] sm:$0xff]  ;;  %v593_v19 = vpop.f32.mrf.mxu2 }
 0x1f0   : > { %711 = vst.msk [vmem:[%s1324_s24 + $0x60] sm:$0xff] %vm286_vm1, %v695_v16 }
 0x1f1   : > { %677 = vst.msk [vmem:[#allocation2 + $0x68] sm:$0xff] %vm286_vm1, %v660_v15 }
 0x1f3   : > { %v642_v21 = vpop.f32.mrf.mxu3 }
 0x1f4   : > { %v643_v22 = vadd.f32 %v642_v21, %v593_v19 }
 0x1f6   : > { %v661_v24 = vadd.f32 %v643_v22, %v543_v20 }
 0x1f7   : > { %v595_v27 = vpop.f32.mrf.mxu2 }
 0x1f8   : > { %v696_v26 = vld [vmem:[#allocation2 + $0x68] sm:$0xff]  ;;  %678 = vst.msk [vmem:[#allocation2 + $0x70] sm:$0xff] %vm286_vm1, %v661_v24 }
 0x1f9   : > { %712 = vst.msk [vmem:[%s1324_s24 + $0x68] sm:$0xff] %vm286_vm1, %v696_v26 }
 0x1fb   : > { %v644_v29 = vpop.f32.mrf.mxu3 }
 0x1fc   : > { %v645_v32 = vadd.f32 %v644_v29, %v595_v27 }
 0x1fe   : > { %v662_v33 = vadd.f32 %v645_v32, %v544_v28 }
 0x1ff   : > { %v697_v34 = vld [vmem:[#allocation2 + $0x70] sm:$0xff] }
 0x200   : > { %713 = vst.msk [vmem:[%s1324_s24 + $0x70] sm:$0xff] %vm286_vm1, %v697_v34 }
 0x201   : > { %679 = vst.msk [vmem:[#allocation2 + $0x78] sm:$0xff] %vm286_vm1, %v662_v33 }
 0x208   : > { %v698_v35 = vld [vmem:[#allocation2 + $0x78] sm:$0xff] }
 0x209   : > { %714 = vst.msk [vmem:[%s1324_s24 + $0x78] sm:$0xff] %vm286_vm1, %v698_v35 }
 0x20a PF: > { %s18_s20 = sadd.s32 1, %s1071_s20   ;;  %s1398_s15 = smov %s1055_s16 }
 0x20b   : > { %p15_p0 = scmp.ge.s32.totalorder %s18_s20, 4   ;;  %s1399_s16 = smov %s1059_s17 }
 0x20c   : > { %s1400_s17 = smov %s1151_s27  ;;  %s1401_s18 = smov %s1067_s19 }
 0x20d   : > { %s1402_s19 = smov %s1404_s22  ;;  %17 = sbr.rel (!%p15_p0) target bundleno = 4 (0x4), region = 92 }
 0x212   :  { %776 = vsyncpa [#allocation5], 1 }
 0x213   :  { %778 = vsyncpa [#allocation5 + $0x1], 1 }

</bundles_post_ra>
